<compile_context>
chip_gen: v6e
topology: v6e:2x2x1
jax: 0.10.0
libtpu: 0.0.40
codegen_flags: <defaults>
</compile_context>

<pallas_src>
import jax
import jax.numpy as jnp
from jax.experimental import pallas as pl
from jax.experimental.pallas import tpu as pltpu


# -----------------------------------------------------------------------------
# Pallas kernel: fused conv1 (4 heads, lane-packed) + conv2 (1 head)
# -----------------------------------------------------------------------------
def fused_gat_kernel(x_ref, xt_ref, w1_ref, adst1x_ref, srcp1_ref,
                     blkr_ref, blkc_ref, b1_ref, elog1_ref, negm_ref,
                     w2_ref, asrc2_ref, adst2_ref, b2_ref, elog2_ref,
                     fold_ref, out_ref):
    H = srcp1_ref.shape[0]          # heads (conv1)
    HID = w2_ref.shape[1]           # per-head hidden dim
    N = negm_ref.shape[0]           # nodes
    NR = out_ref.shape[0]           # = N // FOLD
    FOLD = out_ref.shape[1] // HID  # nodes folded per output row

    f32 = jnp.float32
    bf16 = jnp.bfloat16

    def leaky(v):                                   # LeakyReLU(0.2)
        return jnp.where(v > 0, v, 0.2 * v)

    def elu(v):
        # TODO(synk): switch to jnp.expm1 once its Mosaic lowering is verified.
        return jnp.where(v > 0, v, jnp.exp(jnp.minimum(v, 0.0)) - 1.0)

    # ---- conv1: GATConv(EMB -> HID, heads=H), heads packed on lanes ---------
    xp = jnp.dot(x_ref[...].astype(bf16), w1_ref[...].astype(bf16),
                 preferred_element_type=f32)                      # [N, H*HID]

    # attention scores on the MXU (expanded/block matrices precomputed outside)
    dst_full = jnp.dot(xp, adst1x_ref[...],
                       preferred_element_type=f32)                # [N, H*N]
    s_src_t = jnp.dot(srcp1_ref[...], xt_ref[...],
                      preferred_element_type=f32)                 # [H, N]
    src_row = jnp.concatenate([s_src_t[h:h + 1, :] for h in range(H)],
                              axis=1)                             # [1, H*N]

    negm = negm_ref[...]                                          # [N, N]
    negb = jnp.concatenate([negm] * H, axis=1)                    # [N, H*N]

    logits = dst_full + src_row + elog1_ref[...]                  # [N, H*N]
    masked = leaky(logits) + negb                                 # mask AFTER LeakyReLU

    # per-(node, head) max: 4 small lane-slice reductions, broadcast via 0/1 rows
    blkr = blkr_ref[...]                                          # [H, H*N]
    m_full = jnp.zeros_like(masked)
    for h in range(H):
        m_h = jnp.max(masked[:, h * N:(h + 1) * N], axis=-1, keepdims=True)
        m_full = m_full + m_h * blkr[h:h + 1, :]

    p = jnp.exp(masked - m_full)                                  # [N, H*N] full width
    sums = jnp.dot(p, blkc_ref[...], preferred_element_type=f32)  # [N, H]   (MXU)
    inv = pl.reciprocal(sums, approx=True)                        # EUP
    inv_full = jnp.dot(inv, blkr, preferred_element_type=f32)     # [N, H*N] (MXU bcast)
    alpha = p * inv_full

    # per-head aggregation, concatenated in vregs (no VMEM scratch)
    parts = []
    for h in range(H):
        a_h = alpha[:, h * N:(h + 1) * N].astype(bf16)
        f_h = xp[:, h * HID:(h + 1) * HID].astype(bf16)
        parts.append(jnp.dot(a_h, f_h, preferred_element_type=f32))
    h1 = elu(jnp.concatenate(parts, axis=1) + b1_ref[...])        # [N, H*HID]

    # ---- conv2: GATConv(H*HID -> HID, heads=1) ------------------------------
    xp2 = jnp.dot(h1.astype(bf16), w2_ref[...].astype(bf16),
                  preferred_element_type=f32)                     # [N, HID]
    s_dst2 = jnp.dot(xp2, adst2_ref[...], preferred_element_type=f32)   # [N, 1]
    s_src2 = jnp.dot(xp2, asrc2_ref[...], preferred_element_type=f32)   # [N, 1]
    logits2 = s_dst2 + s_src2.T + elog2_ref[...]                  # [N, N]
    masked2 = leaky(logits2) + negm
    m2 = jnp.max(masked2, axis=-1, keepdims=True)
    p2 = jnp.exp(masked2 - m2)
    inv2 = pl.reciprocal(jnp.sum(p2, axis=-1, keepdims=True), approx=True)
    alpha2 = p2 * inv2
    agg2 = jnp.dot(alpha2.astype(bf16), xp2.astype(bf16),
                   preferred_element_type=f32)                    # [N, HID]
    out2 = elu(agg2 + b2_ref[...])                                # [N, HID]

    # ---- lane-dense writeback: fold FOLD consecutive nodes per 128-lane row --
    fs = fold_ref[...]                                            # [N, N] stacked selectors
    folded = [jnp.dot(fs[j * NR:(j + 1) * NR, :], out2, preferred_element_type=f32)
              for j in range(FOLD)]
    out_ref[...] = jnp.concatenate(folded, axis=1)                # [N/FOLD, FOLD*HID]


# -----------------------------------------------------------------------------
# XLA-side glue: precompute score/broadcast matrices, dense edge logits + mask
# -----------------------------------------------------------------------------
def _precompute_gat_inputs(x, edge_index, edge_attr, params):
    f32 = jnp.float32
    n, emb = x.shape
    w1, w2 = params["w1"], params["w2"]
    att_src1, att_dst1 = params["att_src1"], params["att_dst1"]
    att_edge1, lin_edge1 = params["att_edge1"], params["lin_edge1"]
    att_src2, att_dst2 = params["att_src2"], params["att_dst2"]
    att_edge2, lin_edge2 = params["att_edge2"], params["lin_edge2"]
    H, hid = att_src1.shape

    src, dst = edge_index[0], edge_index[1]
    diag = jnp.arange(n)

    # conv1 score matrices: att_src folded into W1 (src term), att_dst expanded
    # block-diagonally with the neighbor broadcast baked in (dst term).
    src_proj1 = jnp.einsum("ehd,hd->he", w1.reshape(emb, H, hid), att_src1)   # [H, EMB]
    eye_h = jnp.eye(H, dtype=f32)
    adst1_exp = (att_dst1[:, :, None, None] * eye_h[:, None, :, None]
                 * jnp.ones((1, 1, 1, n), f32)).reshape(H * hid, H * n)       # [H*HID, H*N]
    blk_rows = jnp.repeat(eye_h, n, axis=1)                                   # [H, H*N]
    blk_cols = blk_rows.T                                                     # [H*N, H]

    # PyG add_self_loops(fill_value='mean'): per-destination mean of incoming
    # non-self edge_attr (nodes with no incoming edges get zeros).
    non_self = (src != dst).astype(f32)
    deg = jnp.zeros((n,), f32).at[dst].add(non_self)
    attr_sum = jnp.zeros((n, edge_attr.shape[1]), f32).at[dst].add(
        edge_attr * non_self[:, None])
    loop_attr = attr_sum / jnp.maximum(deg, 1.0)[:, None]

    def edge_logits(lin_edge, att_edge, heads):
        e_proj = (edge_attr @ lin_edge).reshape(-1, heads, hid)
        a_e = jnp.sum(e_proj * att_edge.reshape(1, heads, hid), axis=-1)      # [E, heads]
        l_proj = (loop_attr @ lin_edge).reshape(n, heads, hid)
        a_l = jnp.sum(l_proj * att_edge.reshape(1, heads, hid), axis=-1)      # [N, heads]
        # TODO(synk): duplicate (src,dst) edges collapse here (last write wins).
        e = jnp.zeros((n, heads, n), f32).at[dst, :, src].set(a_e)
        e = e.at[diag, :, diag].set(a_l)                                      # self loops
        return e.reshape(n, heads * n)

    elog1 = edge_logits(lin_edge1, att_edge1, H)                              # [N, H*N]
    elog2 = edge_logits(lin_edge2, att_edge2, 1)                              # [N, N]

    # Additive adjacency mask (applied after LeakyReLU inside the kernel).
    negmask = jnp.full((n, n), -1e30, f32).at[dst, src].set(0.0)
    negmask = negmask.at[diag, diag].set(0.0)

    # Lane-dense output: fold `fold` consecutive nodes into one 128-lane row.
    fold = 128 // hid if (hid <= 128 and 128 % hid == 0) else 1
    if n % fold != 0:
        fold = 1
    if fold > 1:
        rr = jnp.arange(n // fold)
        fold_sel = jnp.concatenate(
            [jnp.zeros((n // fold, n), f32).at[rr, fold * rr + j].set(1.0)
             for j in range(fold)], axis=0)                                   # [N, N]
    else:
        fold_sel = jnp.eye(n, dtype=f32)

    inputs = (x, x.T, w1, adst1_exp, src_proj1, blk_rows, blk_cols,
              params["bias1"], elog1, negmask,
              w2, att_src2.reshape(hid, 1), att_dst2.reshape(hid, 1),
              params["bias2"], elog2, fold_sel)
    return inputs, hid, fold


def temporal_gnn_forward(node_ids, edge_index, edge_attr, params):
    # EmbeddingBagCollection with one id per bag (sum pooling) == table lookup.
    # TODO(synk): true jagged multi-id-per-bag pooling not modeled.
    x = jnp.take(params["emb_table"], node_ids, axis=0)              # [N, EMB]
    n, emb = x.shape

    inputs, hid, fold = _precompute_gat_inputs(x, edge_index, edge_attr, params)
    H = params["att_src1"].shape[0]
    hhid = H * hid

    flops = int(2 * n * emb * hhid                # x @ w1
                + 2 * n * hhid * (H * n)          # dst-score expansion matmul
                + 2 * H * emb * n                 # src scores
                + 4 * n * (H * n) * H             # softmax sum + broadcast matmuls
                + 2 * H * n * n * hid             # conv1 aggregation
                + 2 * n * hhid * hid              # h1 @ w2
                + 2 * n * n * hid                 # conv2 aggregation
                + 2 * n * n * hid                 # output fold
                + 20 * (H + 1) * n * n)           # softmax elementwise work
    transcendentals = int((H + 1) * n * n + n * (hhid + hid))
    bytes_accessed = sum(int(a.size) * 4 for a in inputs) + n * hid * 4

    vmem = pl.BlockSpec(memory_space=pltpu.MemorySpace.VMEM)
    out = pl.pallas_call(
        fused_gat_kernel,
        out_shape=jax.ShapeDtypeStruct((n // fold, fold * hid), jnp.float32),
        in_specs=[vmem] * len(inputs),
        out_specs=vmem,
        cost_estimate=pl.CostEstimate(flops=flops,
                                      transcendentals=transcendentals,
                                      bytes_accessed=bytes_accessed),
    )(*inputs)
    return out.reshape(n, hid)


# -----------------------------------------------------------------------------
# Deterministic parameter init + run
# -----------------------------------------------------------------------------
def init_params(key, table_size, emb, hid, heads, edge_dim):
    ks = jax.random.split(key, 16)
    s = 0.1
    return {
        "emb_table": s * jax.random.normal(ks[0], (table_size, emb), jnp.float32),
        # GATConv 1 (heads packed on the output/lane dim)
        "w1": s * jax.random.normal(ks[1], (emb, heads * hid), jnp.float32),
        "att_src1": s * jax.random.normal(ks[2], (heads, hid), jnp.float32),
        "att_dst1": s * jax.random.normal(ks[3], (heads, hid), jnp.float32),
        "att_edge1": s * jax.random.normal(ks[4], (heads, hid), jnp.float32),
        "lin_edge1": s * jax.random.normal(ks[5], (edge_dim, heads * hid), jnp.float32),
        "bias1": s * jax.random.normal(ks[6], (1, heads * hid), jnp.float32),
        # GATConv 2
        "w2": s * jax.random.normal(ks[7], (heads * hid, hid), jnp.float32),
        "att_src2": s * jax.random.normal(ks[8], (1, hid), jnp.float32),
        "att_dst2": s * jax.random.normal(ks[9], (1, hid), jnp.float32),
        "att_edge2": s * jax.random.normal(ks[10], (1, hid), jnp.float32),
        "lin_edge2": s * jax.random.normal(ks[11], (edge_dim, hid), jnp.float32),
        "bias2": s * jax.random.normal(ks[12], (1, hid), jnp.float32),
    }


if __name__ == "__main__":
    TABLE_SIZE = 64   # num_nodes in the embedding table
    EMB = 32          # embedding_dim
    HID = 32          # hidden_dim
    HEADS = 4         # num_heads
    N = 16            # nodes in this graph/batch
    E = 40            # edges
    EDGE_DIM = 8      # edge_attr feature dim

    key = jax.random.PRNGKey(0)
    k_par, k_ids, k_src, k_dst, k_attr = jax.random.split(key, 5)

    params = init_params(k_par, TABLE_SIZE, EMB, HID, HEADS, EDGE_DIM)

    node_ids = jax.random.randint(k_ids, (N,), 0, TABLE_SIZE, dtype=jnp.int32)
    src = jax.random.randint(k_src, (E,), 0, N, dtype=jnp.int32)
    dst = jax.random.randint(k_dst, (E,), 0, N, dtype=jnp.int32)
    edge_index = jnp.stack([src, dst])                       # [2, E] (src; dst)
    edge_attr = jax.random.normal(k_attr, (E, EDGE_DIM), jnp.float32)

    out = jax.jit(temporal_gnn_forward)(node_ids, edge_index, edge_attr, params)
    jax.block_until_ready(out)
    assert out.shape == (N, HID) and out.dtype == jnp.float32
    assert bool(jnp.all(jnp.isfinite(out)))
    print("KERNEL_OK")
</pallas_src>

<mosaic_0001>
module attributes {stable_mosaic.version = 11 : i64} {
  func.func private @main(%arg0: i32) attributes {dimension_semantics = [#tpu.dimension_semantics<core_parallel>], iteration_bounds = array<i64: 2>, tpu.core_type = #tpu.core_type<sc_scalar_subcore>, window_params = []} {
    return
  }
}

module attributes {stable_mosaic.version = 11 : i64} {
  func.func private @main(%arg0: i32) attributes {dimension_semantics = [#tpu.dimension_semantics<core_parallel>], iteration_bounds = array<i64: 2>, tpu.core_type = #tpu.core_type<sc_scalar_subcore>, window_params = []} {
    return
  }
}

module attributes {stable_mosaic.version = 11 : i64} {
  func.func @fused_gat_kernel(%arg0: memref<16x32xf32, #tpu.memory_space<vmem>>, %arg1: memref<32x16xf32, #tpu.memory_space<vmem>>, %arg2: memref<32x128xf32, #tpu.memory_space<vmem>>, %arg3: memref<128x64xf32, #tpu.memory_space<vmem>>, %arg4: memref<4x32xf32, #tpu.memory_space<vmem>>, %arg5: memref<4x64xf32, #tpu.memory_space<vmem>>, %arg6: memref<64x4xf32, #tpu.memory_space<vmem>>, %arg7: memref<1x128xf32, #tpu.memory_space<vmem>>, %arg8: memref<16x64xf32, #tpu.memory_space<vmem>>, %arg9: memref<16x16xf32, #tpu.memory_space<vmem>>, %arg10: memref<128x32xf32, #tpu.memory_space<vmem>>, %arg11: memref<32x1xf32, #tpu.memory_space<vmem>>, %arg12: memref<32x1xf32, #tpu.memory_space<vmem>>, %arg13: memref<1x32xf32, #tpu.memory_space<vmem>>, %arg14: memref<16x16xf32, #tpu.memory_space<vmem>>, %arg15: memref<16x16xf32, #tpu.memory_space<vmem>>, %arg16: memref<4x128xf32, #tpu.memory_space<vmem>>) attributes {dimension_semantics = [], scalar_prefetch = 0 : i64, scratch_operands = 0 : i64, tpu.core_type = #tpu.core_type<tc>} {
    %c0 = arith.constant 0 : index
    %c0_0 = arith.constant 0 : index
    %0 = vector.load %arg0[%c0, %c0_0] : memref<16x32xf32, #tpu.memory_space<vmem>>, vector<16x32xf32>
    %1 = arith.truncf %0 : vector<16x32xf32> to vector<16x32xbf16>
    %c0_1 = arith.constant 0 : index
    %c0_2 = arith.constant 0 : index
    %2 = vector.load %arg2[%c0_1, %c0_2] : memref<32x128xf32, #tpu.memory_space<vmem>>, vector<32x128xf32>
    %3 = arith.truncf %2 : vector<32x128xf32> to vector<32x128xbf16>
    %cst = arith.constant dense<0.000000e+00> : vector<16x128xf32>
    %4 = tpu.matmul %1, %3, %cst {dimension_numbers = #tpu.dot_dimension_numbers<[1], [0], [0], [1], [0, 0, 1, 1], [], []>} : vector<16x32xbf16>, vector<32x128xbf16>, vector<16x128xf32> -> vector<16x128xf32>
    %c0_3 = arith.constant 0 : index
    %c0_4 = arith.constant 0 : index
    %5 = vector.load %arg3[%c0_3, %c0_4] : memref<128x64xf32, #tpu.memory_space<vmem>>, vector<128x64xf32>
    %cst_5 = arith.constant dense<0.000000e+00> : vector<16x64xf32>
    %6 = tpu.matmul %4, %5, %cst_5 {dimension_numbers = #tpu.dot_dimension_numbers<[1], [0], [0], [1], [0, 0, 1, 1], [], []>} : vector<16x128xf32>, vector<128x64xf32>, vector<16x64xf32> -> vector<16x64xf32>
    %c0_6 = arith.constant 0 : index
    %c0_7 = arith.constant 0 : index
    %7 = vector.load %arg4[%c0_6, %c0_7] : memref<4x32xf32, #tpu.memory_space<vmem>>, vector<4x32xf32>
    %c0_8 = arith.constant 0 : index
    %c0_9 = arith.constant 0 : index
    %8 = vector.load %arg1[%c0_8, %c0_9] : memref<32x16xf32, #tpu.memory_space<vmem>>, vector<32x16xf32>
    %cst_10 = arith.constant dense<0.000000e+00> : vector<4x16xf32>
    %9 = tpu.matmul %7, %8, %cst_10 {dimension_numbers = #tpu.dot_dimension_numbers<[1], [0], [0], [1], [0, 0, 1, 1], [], []>} : vector<4x32xf32>, vector<32x16xf32>, vector<4x16xf32> -> vector<4x16xf32>
    %10 = vector.extract_strided_slice %9 {offsets = [0, 0], sizes = [1, 16], strides = [1, 1]} : vector<4x16xf32> to vector<1x16xf32>
    %11 = vector.extract_strided_slice %9 {offsets = [1, 0], sizes = [1, 16], strides = [1, 1]} : vector<4x16xf32> to vector<1x16xf32>
    %12 = vector.extract_strided_slice %9 {offsets = [2, 0], sizes = [1, 16], strides = [1, 1]} : vector<4x16xf32> to vector<1x16xf32>
    %13 = vector.extract_strided_slice %9 {offsets = [3, 0], sizes = [1, 16], strides = [1, 1]} : vector<4x16xf32> to vector<1x16xf32>
    %14 = tpu.concatenate %10, %11, %12, %13 in 1 : vector<1x16xf32>, vector<1x16xf32>, vector<1x16xf32>, vector<1x16xf32> -> vector<1x64xf32>
    %c0_11 = arith.constant 0 : index
    %c0_12 = arith.constant 0 : index
    %15 = vector.load %arg9[%c0_11, %c0_12] : memref<16x16xf32, #tpu.memory_space<vmem>>, vector<16x16xf32>
    %16 = tpu.concatenate %15, %15, %15, %15 in 1 : vector<16x16xf32>, vector<16x16xf32>, vector<16x16xf32>, vector<16x16xf32> -> vector<16x64xf32>
    %17 = vector.broadcast %14 : vector<1x64xf32> to vector<16x64xf32>
    %18 = arith.addf %6, %17 : vector<16x64xf32>
    %c0_13 = arith.constant 0 : index
    %c0_14 = arith.constant 0 : index
    %19 = vector.load %arg8[%c0_13, %c0_14] : memref<16x64xf32, #tpu.memory_space<vmem>>, vector<16x64xf32>
    %20 = arith.addf %18, %19 : vector<16x64xf32>
    %cst_15 = arith.constant 0.000000e+00 : f32
    %21 = vector.broadcast %cst_15 : f32 to vector<16x64xf32>
    %22 = arith.cmpf ogt, %20, %21 : vector<16x64xf32>
    %cst_16 = arith.constant 2.000000e-01 : f32
    %23 = vector.broadcast %cst_16 : f32 to vector<16x64xf32>
    %24 = arith.mulf %23, %20 : vector<16x64xf32>
    %25 = arith.select %22, %20, %24 : vector<16x64xi1>, vector<16x64xf32>
    %26 = arith.addf %25, %16 : vector<16x64xf32>
    %c0_17 = arith.constant 0 : index
    %c0_18 = arith.constant 0 : index
    %27 = vector.load %arg5[%c0_17, %c0_18] : memref<4x64xf32, #tpu.memory_space<vmem>>, vector<4x64xf32>
    %cst_19 = arith.constant 0.000000e+00 : f32
    %28 = vector.broadcast %cst_19 : f32 to vector<16x64xf32>
    %29 = vector.extract_strided_slice %26 {offsets = [0, 0], sizes = [16, 16], strides = [1, 1]} : vector<16x64xf32> to vector<16x16xf32>
    %cst_20 = arith.constant dense<0xFF800000> : vector<16xf32>
    %30 = vector.multi_reduction <maximumf>, %29, %cst_20 [1] : vector<16x16xf32> to vector<16xf32>
    %31 = vector.shape_cast %30 : vector<16xf32> to vector<16x1xf32>
    %32 = vector.extract_strided_slice %27 {offsets = [0, 0], sizes = [1, 64], strides = [1, 1]} : vector<4x64xf32> to vector<1x64xf32>
    %33 = vector.broadcast %31 : vector<16x1xf32> to vector<16x64xf32>
    %34 = vector.broadcast %32 : vector<1x64xf32> to vector<16x64xf32>
    %35 = arith.mulf %33, %34 : vector<16x64xf32>
    %36 = arith.addf %28, %35 : vector<16x64xf32>
    %37 = vector.extract_strided_slice %26 {offsets = [0, 16], sizes = [16, 16], strides = [1, 1]} : vector<16x64xf32> to vector<16x16xf32>
    %cst_21 = arith.constant dense<0xFF800000> : vector<16xf32>
    %38 = vector.multi_reduction <maximumf>, %37, %cst_21 [1] : vector<16x16xf32> to vector<16xf32>
    %39 = vector.shape_cast %38 : vector<16xf32> to vector<16x1xf32>
    %40 = vector.extract_strided_slice %27 {offsets = [1, 0], sizes = [1, 64], strides = [1, 1]} : vector<4x64xf32> to vector<1x64xf32>
    %41 = vector.broadcast %39 : vector<16x1xf32> to vector<16x64xf32>
    %42 = vector.broadcast %40 : vector<1x64xf32> to vector<16x64xf32>
    %43 = arith.mulf %41, %42 : vector<16x64xf32>
    %44 = arith.addf %36, %43 : vector<16x64xf32>
    %45 = vector.extract_strided_slice %26 {offsets = [0, 32], sizes = [16, 16], strides = [1, 1]} : vector<16x64xf32> to vector<16x16xf32>
    %cst_22 = arith.constant dense<0xFF800000> : vector<16xf32>
    %46 = vector.multi_reduction <maximumf>, %45, %cst_22 [1] : vector<16x16xf32> to vector<16xf32>
    %47 = vector.shape_cast %46 : vector<16xf32> to vector<16x1xf32>
    %48 = vector.extract_strided_slice %27 {offsets = [2, 0], sizes = [1, 64], strides = [1, 1]} : vector<4x64xf32> to vector<1x64xf32>
    %49 = vector.broadcast %47 : vector<16x1xf32> to vector<16x64xf32>
    %50 = vector.broadcast %48 : vector<1x64xf32> to vector<16x64xf32>
    %51 = arith.mulf %49, %50 : vector<16x64xf32>
    %52 = arith.addf %44, %51 : vector<16x64xf32>
    %53 = vector.extract_strided_slice %26 {offsets = [0, 48], sizes = [16, 16], strides = [1, 1]} : vector<16x64xf32> to vector<16x16xf32>
    %cst_23 = arith.constant dense<0xFF800000> : vector<16xf32>
    %54 = vector.multi_reduction <maximumf>, %53, %cst_23 [1] : vector<16x16xf32> to vector<16xf32>
    %55 = vector.shape_cast %54 : vector<16xf32> to vector<16x1xf32>
    %56 = vector.extract_strided_slice %27 {offsets = [3, 0], sizes = [1, 64], strides = [1, 1]} : vector<4x64xf32> to vector<1x64xf32>
    %57 = vector.broadcast %55 : vector<16x1xf32> to vector<16x64xf32>
    %58 = vector.broadcast %56 : vector<1x64xf32> to vector<16x64xf32>
    %59 = arith.mulf %57, %58 : vector<16x64xf32>
    %60 = arith.addf %52, %59 : vector<16x64xf32>
    %61 = arith.subf %26, %60 : vector<16x64xf32>
    %62 = math.exp %61 : vector<16x64xf32>
    %c0_24 = arith.constant 0 : index
    %c0_25 = arith.constant 0 : index
    %63 = vector.load %arg6[%c0_24, %c0_25] : memref<64x4xf32, #tpu.memory_space<vmem>>, vector<64x4xf32>
    %cst_26 = arith.constant dense<0.000000e+00> : vector<16x4xf32>
    %64 = tpu.matmul %62, %63, %cst_26 {dimension_numbers = #tpu.dot_dimension_numbers<[1], [0], [0], [1], [0, 0, 1, 1], [], []>} : vector<16x64xf32>, vector<64x4xf32>, vector<16x4xf32> -> vector<16x4xf32>
    %65 = tpu.reciprocal %64 {approx = true} : vector<16x4xf32> -> vector<16x4xf32>
    %cst_27 = arith.constant dense<0.000000e+00> : vector<16x64xf32>
    %66 = tpu.matmul %65, %27, %cst_27 {dimension_numbers = #tpu.dot_dimension_numbers<[1], [0], [0], [1], [0, 0, 1, 1], [], []>} : vector<16x4xf32>, vector<4x64xf32>, vector<16x64xf32> -> vector<16x64xf32>
    %67 = arith.mulf %62, %66 : vector<16x64xf32>
    %68 = vector.extract_strided_slice %67 {offsets = [0, 0], sizes = [16, 16], strides = [1, 1]} : vector<16x64xf32> to vector<16x16xf32>
    %69 = arith.truncf %68 : vector<16x16xf32> to vector<16x16xbf16>
    %70 = vector.extract_strided_slice %4 {offsets = [0, 0], sizes = [16, 32], strides = [1, 1]} : vector<16x128xf32> to vector<16x32xf32>
    %71 = arith.truncf %70 : vector<16x32xf32> to vector<16x32xbf16>
    %cst_28 = arith.constant dense<0.000000e+00> : vector<16x32xf32>
    %72 = tpu.matmul %69, %71, %cst_28 {dimension_numbers = #tpu.dot_dimension_numbers<[1], [0], [0], [1], [0, 0, 1, 1], [], []>} : vector<16x16xbf16>, vector<16x32xbf16>, vector<16x32xf32> -> vector<16x32xf32>
    %73 = vector.extract_strided_slice %67 {offsets = [0, 16], sizes = [16, 16], strides = [1, 1]} : vector<16x64xf32> to vector<16x16xf32>
    %74 = arith.truncf %73 : vector<16x16xf32> to vector<16x16xbf16>
    %75 = vector.extract_strided_slice %4 {offsets = [0, 32], sizes = [16, 32], strides = [1, 1]} : vector<16x128xf32> to vector<16x32xf32>
    %76 = arith.truncf %75 : vector<16x32xf32> to vector<16x32xbf16>
    %cst_29 = arith.constant dense<0.000000e+00> : vector<16x32xf32>
    %77 = tpu.matmul %74, %76, %cst_29 {dimension_numbers = #tpu.dot_dimension_numbers<[1], [0], [0], [1], [0, 0, 1, 1], [], []>} : vector<16x16xbf16>, vector<16x32xbf16>, vector<16x32xf32> -> vector<16x32xf32>
    %78 = vector.extract_strided_slice %67 {offsets = [0, 32], sizes = [16, 16], strides = [1, 1]} : vector<16x64xf32> to vector<16x16xf32>
    %79 = arith.truncf %78 : vector<16x16xf32> to vector<16x16xbf16>
    %80 = vector.extract_strided_slice %4 {offsets = [0, 64], sizes = [16, 32], strides = [1, 1]} : vector<16x128xf32> to vector<16x32xf32>
    %81 = arith.truncf %80 : vector<16x32xf32> to vector<16x32xbf16>
    %cst_30 = arith.constant dense<0.000000e+00> : vector<16x32xf32>
    %82 = tpu.matmul %79, %81, %cst_30 {dimension_numbers = #tpu.dot_dimension_numbers<[1], [0], [0], [1], [0, 0, 1, 1], [], []>} : vector<16x16xbf16>, vector<16x32xbf16>, vector<16x32xf32> -> vector<16x32xf32>
    %83 = vector.extract_strided_slice %67 {offsets = [0, 48], sizes = [16, 16], strides = [1, 1]} : vector<16x64xf32> to vector<16x16xf32>
    %84 = arith.truncf %83 : vector<16x16xf32> to vector<16x16xbf16>
    %85 = vector.extract_strided_slice %4 {offsets = [0, 96], sizes = [16, 32], strides = [1, 1]} : vector<16x128xf32> to vector<16x32xf32>
    %86 = arith.truncf %85 : vector<16x32xf32> to vector<16x32xbf16>
    %cst_31 = arith.constant dense<0.000000e+00> : vector<16x32xf32>
    %87 = tpu.matmul %84, %86, %cst_31 {dimension_numbers = #tpu.dot_dimension_numbers<[1], [0], [0], [1], [0, 0, 1, 1], [], []>} : vector<16x16xbf16>, vector<16x32xbf16>, vector<16x32xf32> -> vector<16x32xf32>
    %88 = tpu.concatenate %72, %77, %82, %87 in 1 : vector<16x32xf32>, vector<16x32xf32>, vector<16x32xf32>, vector<16x32xf32> -> vector<16x128xf32>
    %c0_32 = arith.constant 0 : index
    %c0_33 = arith.constant 0 : index
    %89 = vector.load %arg7[%c0_32, %c0_33] : memref<1x128xf32, #tpu.memory_space<vmem>>, vector<1x128xf32>
    %90 = vector.broadcast %89 : vector<1x128xf32> to vector<16x128xf32>
    %91 = arith.addf %88, %90 : vector<16x128xf32>
    %cst_34 = arith.constant 0.000000e+00 : f32
    %92 = vector.broadcast %cst_34 : f32 to vector<16x128xf32>
    %93 = arith.cmpf ogt, %91, %92 : vector<16x128xf32>
    %cst_35 = arith.constant 0.000000e+00 : f32
    %94 = vector.broadcast %cst_35 : f32 to vector<16x128xf32>
    %95 = arith.minimumf %91, %94 : vector<16x128xf32>
    %96 = math.exp %95 : vector<16x128xf32>
    %cst_36 = arith.constant 1.000000e+00 : f32
    %97 = vector.broadcast %cst_36 : f32 to vector<16x128xf32>
    %98 = arith.subf %96, %97 : vector<16x128xf32>
    %99 = arith.select %93, %91, %98 : vector<16x128xi1>, vector<16x128xf32>
    %100 = arith.truncf %99 : vector<16x128xf32> to vector<16x128xbf16>
    %c0_37 = arith.constant 0 : index
    %c0_38 = arith.constant 0 : index
    %101 = vector.load %arg10[%c0_37, %c0_38] : memref<128x32xf32, #tpu.memory_space<vmem>>, vector<128x32xf32>
    %102 = arith.truncf %101 : vector<128x32xf32> to vector<128x32xbf16>
    %cst_39 = arith.constant dense<0.000000e+00> : vector<16x32xf32>
    %103 = tpu.matmul %100, %102, %cst_39 {dimension_numbers = #tpu.dot_dimension_numbers<[1], [0], [0], [1], [0, 0, 1, 1], [], []>} : vector<16x128xbf16>, vector<128x32xbf16>, vector<16x32xf32> -> vector<16x32xf32>
    %c0_40 = arith.constant 0 : index
    %c0_41 = arith.constant 0 : index
    %104 = vector.load %arg12[%c0_40, %c0_41] : memref<32x1xf32, #tpu.memory_space<vmem>>, vector<32x1xf32>
    %cst_42 = arith.constant dense<0.000000e+00> : vector<16x1xf32>
    %105 = tpu.matmul %103, %104, %cst_42 {dimension_numbers = #tpu.dot_dimension_numbers<[1], [0], [0], [1], [0, 0, 1, 1], [], []>} : vector<16x32xf32>, vector<32x1xf32>, vector<16x1xf32> -> vector<16x1xf32>
    %c0_43 = arith.constant 0 : index
    %c0_44 = arith.constant 0 : index
    %106 = vector.load %arg11[%c0_43, %c0_44] : memref<32x1xf32, #tpu.memory_space<vmem>>, vector<32x1xf32>
    %cst_45 = arith.constant dense<0.000000e+00> : vector<16x1xf32>
    %107 = tpu.matmul %103, %106, %cst_45 {dimension_numbers = #tpu.dot_dimension_numbers<[1], [0], [0], [1], [0, 0, 1, 1], [], []>} : vector<16x32xf32>, vector<32x1xf32>, vector<16x1xf32> -> vector<16x1xf32>
    %108 = tpu.transpose %107, [1, 0] : vector<16x1xf32> -> vector<1x16xf32>
    %109 = vector.broadcast %105 : vector<16x1xf32> to vector<16x16xf32>
    %110 = vector.broadcast %108 : vector<1x16xf32> to vector<16x16xf32>
    %111 = arith.addf %109, %110 : vector<16x16xf32>
    %c0_46 = arith.constant 0 : index
    %c0_47 = arith.constant 0 : index
    %112 = vector.load %arg14[%c0_46, %c0_47] : memref<16x16xf32, #tpu.memory_space<vmem>>, vector<16x16xf32>
    %113 = arith.addf %111, %112 : vector<16x16xf32>
    %cst_48 = arith.constant 0.000000e+00 : f32
    %114 = vector.broadcast %cst_48 : f32 to vector<16x16xf32>
    %115 = arith.cmpf ogt, %113, %114 : vector<16x16xf32>
    %cst_49 = arith.constant 2.000000e-01 : f32
    %116 = vector.broadcast %cst_49 : f32 to vector<16x16xf32>
    %117 = arith.mulf %116, %113 : vector<16x16xf32>
    %118 = arith.select %115, %113, %117 : vector<16x16xi1>, vector<16x16xf32>
    %119 = arith.addf %118, %15 : vector<16x16xf32>
    %cst_50 = arith.constant dense<0xFF800000> : vector<16xf32>
    %120 = vector.multi_reduction <maximumf>, %119, %cst_50 [1] : vector<16x16xf32> to vector<16xf32>
    %121 = vector.shape_cast %120 : vector<16xf32> to vector<16x1xf32>
    %122 = vector.broadcast %121 : vector<16x1xf32> to vector<16x16xf32>
    %123 = arith.subf %119, %122 : vector<16x16xf32>
    %124 = math.exp %123 : vector<16x16xf32>
    %cst_51 = arith.constant dense<0.000000e+00> : vector<16xf32>
    %125 = vector.multi_reduction <add>, %124, %cst_51 [1] : vector<16x16xf32> to vector<16xf32>
    %126 = vector.shape_cast %125 : vector<16xf32> to vector<16x1xf32>
    %127 = tpu.reciprocal %126 {approx = true} : vector<16x1xf32> -> vector<16x1xf32>
    %128 = vector.broadcast %127 : vector<16x1xf32> to vector<16x16xf32>
    %129 = arith.mulf %124, %128 : vector<16x16xf32>
    %130 = arith.truncf %129 : vector<16x16xf32> to vector<16x16xbf16>
    %131 = arith.truncf %103 : vector<16x32xf32> to vector<16x32xbf16>
    %cst_52 = arith.constant dense<0.000000e+00> : vector<16x32xf32>
    %132 = tpu.matmul %130, %131, %cst_52 {dimension_numbers = #tpu.dot_dimension_numbers<[1], [0], [0], [1], [0, 0, 1, 1], [], []>} : vector<16x16xbf16>, vector<16x32xbf16>, vector<16x32xf32> -> vector<16x32xf32>
    %c0_53 = arith.constant 0 : index
    %c0_54 = arith.constant 0 : index
    %133 = vector.load %arg13[%c0_53, %c0_54] : memref<1x32xf32, #tpu.memory_space<vmem>>, vector<1x32xf32>
    %134 = vector.broadcast %133 : vector<1x32xf32> to vector<16x32xf32>
    %135 = arith.addf %132, %134 : vector<16x32xf32>
    %cst_55 = arith.constant 0.000000e+00 : f32
    %136 = vector.broadcast %cst_55 : f32 to vector<16x32xf32>
    %137 = arith.cmpf ogt, %135, %136 : vector<16x32xf32>
    %cst_56 = arith.constant 0.000000e+00 : f32
    %138 = vector.broadcast %cst_56 : f32 to vector<16x32xf32>
    %139 = arith.minimumf %135, %138 : vector<16x32xf32>
    %140 = math.exp %139 : vector<16x32xf32>
    %cst_57 = arith.constant 1.000000e+00 : f32
    %141 = vector.broadcast %cst_57 : f32 to vector<16x32xf32>
    %142 = arith.subf %140, %141 : vector<16x32xf32>
    %143 = arith.select %137, %135, %142 : vector<16x32xi1>, vector<16x32xf32>
    %c0_58 = arith.constant 0 : index
    %c0_59 = arith.constant 0 : index
    %144 = vector.load %arg15[%c0_58, %c0_59] : memref<16x16xf32, #tpu.memory_space<vmem>>, vector<16x16xf32>
    %145 = vector.extract_strided_slice %144 {offsets = [0, 0], sizes = [4, 16], strides = [1, 1]} : vector<16x16xf32> to vector<4x16xf32>
    %cst_60 = arith.constant dense<0.000000e+00> : vector<4x32xf32>
    %146 = tpu.matmul %145, %143, %cst_60 {dimension_numbers = #tpu.dot_dimension_numbers<[1], [0], [0], [1], [0, 0, 1, 1], [], []>} : vector<4x16xf32>, vector<16x32xf32>, vector<4x32xf32> -> vector<4x32xf32>
    %147 = vector.extract_strided_slice %144 {offsets = [4, 0], sizes = [4, 16], strides = [1, 1]} : vector<16x16xf32> to vector<4x16xf32>
    %cst_61 = arith.constant dense<0.000000e+00> : vector<4x32xf32>
    %148 = tpu.matmul %147, %143, %cst_61 {dimension_numbers = #tpu.dot_dimension_numbers<[1], [0], [0], [1], [0, 0, 1, 1], [], []>} : vector<4x16xf32>, vector<16x32xf32>, vector<4x32xf32> -> vector<4x32xf32>
    %149 = vector.extract_strided_slice %144 {offsets = [8, 0], sizes = [4, 16], strides = [1, 1]} : vector<16x16xf32> to vector<4x16xf32>
    %cst_62 = arith.constant dense<0.000000e+00> : vector<4x32xf32>
    %150 = tpu.matmul %149, %143, %cst_62 {dimension_numbers = #tpu.dot_dimension_numbers<[1], [0], [0], [1], [0, 0, 1, 1], [], []>} : vector<4x16xf32>, vector<16x32xf32>, vector<4x32xf32> -> vector<4x32xf32>
    %151 = vector.extract_strided_slice %144 {offsets = [12, 0], sizes = [4, 16], strides = [1, 1]} : vector<16x16xf32> to vector<4x16xf32>
    %cst_63 = arith.constant dense<0.000000e+00> : vector<4x32xf32>
    %152 = tpu.matmul %151, %143, %cst_63 {dimension_numbers = #tpu.dot_dimension_numbers<[1], [0], [0], [1], [0, 0, 1, 1], [], []>} : vector<4x16xf32>, vector<16x32xf32>, vector<4x32xf32> -> vector<4x32xf32>
    %153 = tpu.concatenate %146, %148, %150, %152 in 1 : vector<4x32xf32>, vector<4x32xf32>, vector<4x32xf32>, vector<4x32xf32> -> vector<4x128xf32>
    %c0_64 = arith.constant 0 : index
    %c0_65 = arith.constant 0 : index
    %154 = vector.load %arg16[%c0_64, %c0_65] : memref<4x128xf32, #tpu.memory_space<vmem>>, vector<4x128xf32>
    tpu.vector_store %arg16[%c0_64, %c0_65], %153 {strides = array<i32>} : memref<4x128xf32, #tpu.memory_space<vmem>>, vector<4x128xf32>,
    return
  }
}

</mosaic_0001>

<bundles_post_ra>
// kernel: mul.43
= control target key start
LH: loop header
LB: loop body
LE: loop exit
PB: predicated region body
PF: predicated region fallthrough
CT: control target
= control target key end

     0   :  { %s418_s0 = inlined_call_operand.vmem [shape: f32[4,32,4], index: 0, kind: input, shape index: {}]   ;;  %s419_s1 = inlined_call_operand.vmem [shape: f32[4,32,4,16], index: 1, kind: output, shape index: {}]  }
   0x1   :  { %v4_v0 = vld [vmem:[%s418_s0] sm:$0xf]  ;;  %v138_v1 = vld [vmem:[%s418_s0 + $0x4] sm:$0xf]  ;;  %v140_v2 = vld [vmem:[%s418_s0 + $0x8] sm:$0xf] }
   0x2   :  { %5 = vst [vmem:[%s419_s1] sm:$0xf] %v4_v0  ;;  %139 = vst [vmem:[%s419_s1 + $0x40] sm:$0xf] %v138_v1  ;;  %v142_v3 = vld [vmem:[%s418_s0 + $0xc] sm:$0xf] }
   0x3   :  { %141 = vst [vmem:[%s419_s1 + $0x80] sm:$0xf] %v140_v2  ;;  %144 = vst [vmem:[%s419_s1 + $0x4] sm:$0xf] %v4_v0 }
   0x4   :  { %145 = vst [vmem:[%s419_s1 + $0x44] sm:$0xf] %v138_v1  ;;  %146 = vst [vmem:[%s419_s1 + $0x84] sm:$0xf] %v140_v2 }
   0x5   :  { %148 = vst [vmem:[%s419_s1 + $0x8] sm:$0xf] %v4_v0  ;;  %149 = vst [vmem:[%s419_s1 + $0x48] sm:$0xf] %v138_v1 }
   0x6   :  { %150 = vst [vmem:[%s419_s1 + $0x88] sm:$0xf] %v140_v2  ;;  %152 = vst [vmem:[%s419_s1 + $0xc] sm:$0xf] %v4_v0 }
   0x7   :  { %153 = vst [vmem:[%s419_s1 + $0x4c] sm:$0xf] %v138_v1  ;;  %154 = vst [vmem:[%s419_s1 + $0x8c] sm:$0xf] %v140_v2 }
   0x8   :  { %156 = vst [vmem:[%s419_s1 + $0x10] sm:$0xf] %v4_v0  ;;  %157 = vst [vmem:[%s419_s1 + $0x50] sm:$0xf] %v138_v1 }
   0x9   :  { %158 = vst [vmem:[%s419_s1 + $0x90] sm:$0xf] %v140_v2  ;;  %160 = vst [vmem:[%s419_s1 + $0x14] sm:$0xf] %v4_v0 }
   0xa   :  { %161 = vst [vmem:[%s419_s1 + $0x54] sm:$0xf] %v138_v1  ;;  %162 = vst [vmem:[%s419_s1 + $0x94] sm:$0xf] %v140_v2 }
   0xb   :  { %164 = vst [vmem:[%s419_s1 + $0x18] sm:$0xf] %v4_v0  ;;  %165 = vst [vmem:[%s419_s1 + $0x58] sm:$0xf] %v138_v1 }
   0xc   :  { %166 = vst [vmem:[%s419_s1 + $0x98] sm:$0xf] %v140_v2  ;;  %168 = vst [vmem:[%s419_s1 + $0x1c] sm:$0xf] %v4_v0 }
   0xd   :  { %169 = vst [vmem:[%s419_s1 + $0x5c] sm:$0xf] %v138_v1  ;;  %170 = vst [vmem:[%s419_s1 + $0x9c] sm:$0xf] %v140_v2 }
   0xe   :  { %172 = vst [vmem:[%s419_s1 + $0x20] sm:$0xf] %v4_v0  ;;  %173 = vst [vmem:[%s419_s1 + $0x60] sm:$0xf] %v138_v1 }
   0xf   :  { %174 = vst [vmem:[%s419_s1 + $0xa0] sm:$0xf] %v140_v2  ;;  %176 = vst [vmem:[%s419_s1 + $0x24] sm:$0xf] %v4_v0 }
  0x10   :  { %177 = vst [vmem:[%s419_s1 + $0x64] sm:$0xf] %v138_v1  ;;  %178 = vst [vmem:[%s419_s1 + $0xa4] sm:$0xf] %v140_v2 }
  0x11   :  { %180 = vst [vmem:[%s419_s1 + $0x28] sm:$0xf] %v4_v0  ;;  %181 = vst [vmem:[%s419_s1 + $0x68] sm:$0xf] %v138_v1 }
  0x12   :  { %182 = vst [vmem:[%s419_s1 + $0xa8] sm:$0xf] %v140_v2  ;;  %184 = vst [vmem:[%s419_s1 + $0x2c] sm:$0xf] %v4_v0 }
  0x13   :  { %185 = vst [vmem:[%s419_s1 + $0x6c] sm:$0xf] %v138_v1  ;;  %186 = vst [vmem:[%s419_s1 + $0xac] sm:$0xf] %v140_v2 }
  0x14   :  { %188 = vst [vmem:[%s419_s1 + $0x30] sm:$0xf] %v4_v0  ;;  %189 = vst [vmem:[%s419_s1 + $0x70] sm:$0xf] %v138_v1 }
  0x15   :  { %190 = vst [vmem:[%s419_s1 + $0xb0] sm:$0xf] %v140_v2  ;;  %192 = vst [vmem:[%s419_s1 + $0x34] sm:$0xf] %v4_v0 }
  0x16   :  { %193 = vst [vmem:[%s419_s1 + $0x74] sm:$0xf] %v138_v1  ;;  %194 = vst [vmem:[%s419_s1 + $0xb4] sm:$0xf] %v140_v2 }
  0x17   :  { %196 = vst [vmem:[%s419_s1 + $0x38] sm:$0xf] %v4_v0  ;;  %197 = vst [vmem:[%s419_s1 + $0x78] sm:$0xf] %v138_v1 }
  0x18   :  { %198 = vst [vmem:[%s419_s1 + $0xb8] sm:$0xf] %v140_v2  ;;  %200 = vst [vmem:[%s419_s1 + $0x3c] sm:$0xf] %v4_v0 }
  0x19   :  { %201 = vst [vmem:[%s419_s1 + $0x7c] sm:$0xf] %v138_v1  ;;  %202 = vst [vmem:[%s419_s1 + $0xbc] sm:$0xf] %v140_v2 }
  0x1a   :  { %143 = vst [vmem:[%s419_s1 + $0xc0] sm:$0xf] %v142_v3  ;;  %147 = vst [vmem:[%s419_s1 + $0xc4] sm:$0xf] %v142_v3 }
  0x1b   :  { %151 = vst [vmem:[%s419_s1 + $0xc8] sm:$0xf] %v142_v3  ;;  %155 = vst [vmem:[%s419_s1 + $0xcc] sm:$0xf] %v142_v3 }
  0x1c   :  { %159 = vst [vmem:[%s419_s1 + $0xd0] sm:$0xf] %v142_v3  ;;  %163 = vst [vmem:[%s419_s1 + $0xd4] sm:$0xf] %v142_v3 }
  0x1d   :  { %167 = vst [vmem:[%s419_s1 + $0xd8] sm:$0xf] %v142_v3  ;;  %171 = vst [vmem:[%s419_s1 + $0xdc] sm:$0xf] %v142_v3 }
  0x1e   :  { %175 = vst [vmem:[%s419_s1 + $0xe0] sm:$0xf] %v142_v3  ;;  %179 = vst [vmem:[%s419_s1 + $0xe4] sm:$0xf] %v142_v3 }
  0x1f   :  { %183 = vst [vmem:[%s419_s1 + $0xe8] sm:$0xf] %v142_v3  ;;  %187 = vst [vmem:[%s419_s1 + $0xec] sm:$0xf] %v142_v3 }
  0x20   :  { %191 = vst [vmem:[%s419_s1 + $0xf0] sm:$0xf] %v142_v3  ;;  %195 = vst [vmem:[%s419_s1 + $0xf4] sm:$0xf] %v142_v3 }
  0x21   :  { %199 = vst [vmem:[%s419_s1 + $0xf8] sm:$0xf] %v142_v3  ;;  %203 = vst [vmem:[%s419_s1 + $0xfc] sm:$0xf] %v142_v3 }

// kernel: temporal_gnn_forward.1
= control target key start
LH: loop header
LB: loop body
LE: loop exit
PB: predicated region body
PF: predicated region fallthrough
CT: control target
= control target key end

     0   :  { %v1845_v0 = vmov 0.0   ;;  %vm1846_vm0 = vmmov 0   ;;  %vm63_vm1 = vcmask 261120   ;;  %s1847_s26 = smov 16   ;;  %v248_v44 = vlaneseq  ;;  %s1850_s24 = smov 96   ;;  %s2312_s1 = inlined_call_operand.vmem [shape: f32[32,16], index: 1, kind: input, shape index: {}]   ;;  %s2313_s2 = inlined_call_operand.vmem [shape: f32[32,128], index: 2, kind: input, shape index: {}]   ;;  %s2314_s0 = inlined_call_operand.vmem [shape: f32[16,32], index: 0, kind: input, shape index: {}]   ;;  %s2315_s4 = inlined_call_operand.vmem [shape: f32[4,32], index: 4, kind: input, shape index: {}]   ;;  %s2316_s3 = inlined_call_operand.vmem [shape: f32[128,64], index: 3, kind: input, shape index: {}]   ;;  %s2317_s9 = inlined_call_operand.vmem [shape: f32[16,16], index: 9, kind: input, shape index: {}]   ;;  %s2318_s8 = inlined_call_operand.vmem [shape: f32[16,64], index: 8, kind: input, shape index: {}]   ;;  %s2319_s6 = inlined_call_operand.vmem [shape: f32[64,4], index: 6, kind: input, shape index: {}]   ;;  %s2320_s5 = inlined_call_operand.vmem [shape: f32[4,64], index: 5, kind: input, shape index: {}]   ;;  %s2321_s10 = inlined_call_operand.vmem [shape: f32[128,32], index: 10, kind: input, shape index: {}]   ;;  %s2322_s12 = inlined_call_operand.vmem [shape: f32[32,1], index: 12, kind: input, shape index: {}]   ;;  %s2323_s7 = inlined_call_operand.vmem [shape: f32[1,128], index: 7, kind: input, shape index: {}]   ;;  %s2324_s11 = inlined_call_operand.vmem [shape: f32[32,1], index: 11, kind: input, shape index: {}]   ;;  %s2325_s14 = inlined_call_operand.vmem [shape: f32[16,16], index: 14, kind: input, shape index: {}]   ;;  %s2326_s13 = inlined_call_operand.vmem [shape: f32[1,32], index: 13, kind: input, shape index: {}]   ;;  %s2327_s15 = inlined_call_operand.vmem [shape: f32[16,16], index: 15, kind: input, shape index: {}]   ;;  %s2328_s16 = inlined_call_operand.vmem [shape: f32[4,128], index: 16, kind: output, shape index: {}]  }
   0x1   :  { %2330 = sst [smem:[#allocation2_spill]] %s2312_s1  ;;  %1639 = vmatprep.subr.mxu1 %v1845_v0  ;;  %1631 = vmatprep.subr.bf16.mxu0 %v1845_v0  ;;  %v59_v2 = vld [vmem:[%s2313_s2 + $0x10] sm:$0xff]  ;;  %v60_v3 = vld [vmem:[%s2313_s2 + $0x18] sm:$0xff]  ;;  %v57_v6 = vld [vmem:[%s2313_s2] sm:$0xff]  ;;  %vm215_vm2 = vcmask 130048   ;;  %vm218_vm3 = vcmask 392192  }
   0x2   :  { %s2331_s23 = sld [smem:[#allocation2_spill]]  ;;  %v62_v4 = vpack.c.bf16 %v60_v3, %v59_v2  ;;  %1647 = vmatprep.mubr.msk.f32.mxu1 %vm1846_vm0, %v1845_v0  ;;  %v58_v8 = vld [vmem:[%s2313_s2 + $0x8] sm:$0xff]  ;;  %1635 = vmatprep.mubr.msk.bf16.mxu0 %vm1846_vm0, %v1845_v0  ;;  %v54_v10 = vld [vmem:[%s2314_s0] sm:$0xff]  ;;  %v123_v14 = vld [vmem:[%s2316_s3 + $0x78] sm:$0xff]  ;;  %s1848_s2 = smov 48   ;;  %v2057_v47 = vshrl.u32 %v248_v44, 7 }
   0x3   :  { %v61_v9 = vpack.c.bf16 %v58_v8, %v57_v6  ;;  %v55_v11 = vld [vmem:[%s2314_s0 + $0x8] sm:$0xff]  ;;  %v124_v13 = vld [vmem:[%s2315_s4] sm:$0xf]  ;;  %v122_v16 = vld [vmem:[%s2316_s3 + $0x70] sm:$0xff]  ;;  %vm354_vm5 = vcmask 261248   ;;  %vm369_vm7 = vcmask 392448  }
   0x4   :  { %1632 = vmatpush3.bf16.msra.mxu0 %v62_v4  ;;  %v56_v15 = vpack.c.bf16 %v55_v11, %v54_v10  ;;  %v121_v17 = vld [vmem:[%s2316_s3 + $0x68] sm:$0xff]  ;;  %v120_v18 = vld [vmem:[%s2316_s3 + $0x60] sm:$0xff]  ;;  %v119_v19 = vld [vmem:[%s2316_s3 + $0x58] sm:$0xff]  ;;  %v2062_v52 = vsub.s32 0, %v2057_v47  ;;  %vm384_vm8 = vcmask 523648   ;;  %vm413_vm9 = vcmask 523264  }
   0x5   :  { %1633 = vmatprep.subr.bf16.mxu0 %v1845_v0  ;;  %v118_v20 = vld [vmem:[%s2316_s3 + $0x50] sm:$0xff]  ;;  %v117_v21 = vld [vmem:[%s2316_s3 + $0x48] sm:$0xff]  ;;  %v116_v22 = vld [vmem:[%s2316_s3 + $0x40] sm:$0xff]  ;;  %vm504_vm10 = vcmask 1043456   ;;  %vm497_vm11 = vcmask 31744   ;;  %s1853_s4 = smov 64  }
   0x6   :  { %v115_v23 = vld [vmem:[%s2316_s3 + $0x38] sm:$0xff]  ;;  %v114_v24 = vld [vmem:[%s2316_s3 + $0x30] sm:$0xff]  ;;  %v113_v25 = vld [vmem:[%s2316_s3 + $0x28] sm:$0xff]  ;;  %vm808_vm12 = vcmask 785408  }
   0x7   :  { %v112_v26 = vld [vmem:[%s2316_s3 + $0x20] sm:$0xff]  ;;  %v111_v27 = vld [vmem:[%s2316_s3 + $0x18] sm:$0xff]  ;;  %v110_v28 = vld [vmem:[%s2316_s3 + $0x10] sm:$0xff] }
   0x8   :  { %v128_v1 = vld [vmem:[%s2331_s23 + $0x18] sm:$0xff]  ;;  %v127_v5 = vld [vmem:[%s2331_s23 + $0x10] sm:$0xff]  ;;  %v126_v7 = vld [vmem:[%s2331_s23 + $0x8] sm:$0xff]  ;;  %1634 = vmatpush3.bf16.msra.mxu0 %v61_v9 }
   0x9   :  { %1640 = vmatpush3.msra.mxu1 %v128_v1  ;;  %v125_v12 = vld [vmem:[%s2331_s23] sm:$0xff]  ;;  %1650 = vmatprep.subr.mxu0 %v123_v14  ;;  %v109_v29 = vld [vmem:[%s2316_s3 + $0x8] sm:$0xff] }
   0xa   :  { %1641 = vmatprep.subr.mxu1 %v1845_v0  ;;  %v108_v30 = vld [vmem:[%s2316_s3] sm:$0xff]  ;;  %s1849_s3 = smov 32   ;;  %v2045_v42 = vld [vmem:[%s2317_s9 + $0x8] sm:$0xff] }
   0xb   :  { %1642 = vmatpush3.msra.mxu1 %v127_v5  ;;  %1636 = vmatmul.mubr.msk.bf16.vlgmr.msra.gmra.mxu0 %vm63_vm1, %v56_v15  ;;  %v2037_v38 = vld [vmem:[%s2317_s9] sm:$0xff]  ;;  %v328_v58 = vld [vmem:[%s2318_s8 + $0x8] sm:$0xff] }
   0xc   :  { %1643 = vmatprep.subr.mxu1 %v1845_v0  ;;  %1651 = vmatpush3.msra.mxu0 %v123_v14  ;;  %v327_v62 = vld [vmem:[%s2318_s8] sm:$0xff] }
   0xd   :  { %1644 = vmatpush3.msra.mxu1 %v126_v7  ;;  %1652 = vmatprep.subr.mxu0 %v122_v16 }
   0xe   :  { %1645 = vmatprep.subr.mxu1 %v1845_v0  ;;  %1653 = vmatpush3.msra.mxu0 %v122_v16 }
   0xf   :  { %1646 = vmatpush3.msra.mxu1 %v125_v12  ;;  %1654 = vmatprep.subr.mxu0 %v121_v17 }
  0x10   :  { %1648 = vmatmul.mubr.msk.f32.vlgmr.msra.gmra.mxu1 %vm63_vm1, %v124_v13  ;;  %1655 = vmatpush3.msra.mxu0 %v121_v17 }
  0x11   :  { %1656 = vmatprep.subr.mxu0 %v120_v18 }
  0x12   :  { %1657 = vmatpush3.msra.mxu0 %v120_v18 }
  0x13   :  { %1658 = vmatprep.subr.mxu0 %v119_v19 }
  0x14   :  { %1659 = vmatpush3.msra.mxu0 %v119_v19 }
  0x15   :  { %1660 = vmatprep.subr.mxu0 %v118_v20 }
  0x16   :  { %1661 = vmatpush3.msra.mxu0 %v118_v20 }
  0x17   :  { %1662 = vmatprep.subr.mxu0 %v117_v21 }
  0x18   :  { %1663 = vmatpush3.msra.mxu0 %v117_v21 }
  0x19   :  { %1664 = vmatprep.subr.mxu0 %v116_v22 }
  0x1a   :  { %1665 = vmatpush3.msra.mxu0 %v116_v22 }
  0x1b   :  { %1666 = vmatprep.subr.mxu0 %v115_v23 }
  0x1c   :  { %1667 = vmatpush3.msra.mxu0 %v115_v23 }
  0x1d   :  { %1668 = vmatprep.subr.mxu0 %v114_v24 }
  0x1e   :  { %1669 = vmatpush3.msra.mxu0 %v114_v24  ;;  %v412_v24 = vld [vmem:[%s2319_s6 + $0x38] sm:$0xff] }
  0x1f   :  { %1670 = vmatprep.subr.mxu0 %v113_v25  ;;  %1685 = vmatprep.subr.mxu1 %v412_v24 }
  0x20   :  { %1671 = vmatpush3.msra.mxu0 %v113_v25  ;;  %1686 = vmatpush3.msra.mxu1 %v412_v24  ;;  %v411_v25 = vld [vmem:[%s2319_s6 + $0x30] sm:$0xff] }
  0x21   :  { %1672 = vmatprep.subr.mxu0 %v112_v26  ;;  %1687 = vmatprep.subr.mxu1 %v411_v25 }
  0x22   :  { %1673 = vmatpush3.msra.mxu0 %v112_v26  ;;  %v410_v26 = vld [vmem:[%s2319_s6 + $0x28] sm:$0xff]  ;;  %1688 = vmatpush3.msra.mxu1 %v411_v25 }
  0x23   :  { %1674 = vmatprep.subr.mxu0 %v111_v27  ;;  %1689 = vmatprep.subr.mxu1 %v410_v26 }
  0x24   :  { %1675 = vmatpush3.msra.mxu0 %v111_v27  ;;  %v409_v27 = vld [vmem:[%s2319_s6 + $0x20] sm:$0xff]  ;;  %1690 = vmatpush3.msra.mxu1 %v410_v26 }
  0x25   :  { %1676 = vmatprep.subr.mxu0 %v110_v28  ;;  %1691 = vmatprep.subr.mxu1 %v409_v27 }
  0x26   :  { %1677 = vmatpush3.msra.mxu0 %v110_v28  ;;  %v408_v28 = vld [vmem:[%s2319_s6 + $0x18] sm:$0xff]  ;;  %1692 = vmatpush3.msra.mxu1 %v409_v27  ;;  %v847_v27 = vld [vmem:[%s2321_s10 + $0x70] sm:$0xff] }
  0x27   :  { %1678 = vmatprep.subr.mxu0 %v109_v29  ;;  %1693 = vmatprep.subr.mxu1 %v408_v28 }
  0x28   :  { %1679 = vmatpush3.msra.mxu0 %v109_v29  ;;  %v407_v29 = vld [vmem:[%s2319_s6 + $0x10] sm:$0xff]  ;;  %1694 = vmatpush3.msra.mxu1 %v408_v28  ;;  %v848_v28 = vld [vmem:[%s2321_s10 + $0x78] sm:$0xff] }
  0x29   :  { %1680 = vmatprep.subr.mxu0 %v108_v30  ;;  %1695 = vmatprep.subr.mxu1 %v407_v29 }
  0x2a   :  { %1681 = vmatpush3.msra.mxu0 %v108_v30  ;;  %v406_v30 = vld [vmem:[%s2319_s6 + $0x8] sm:$0xff]  ;;  %1696 = vmatpush3.msra.mxu1 %v407_v29  ;;  %v856_v29 = vpack.c.bf16 %v848_v28, %v847_v27 }
  0x2b   :  { %1721 = vmatprep.subr.bf16.mxu0 %v1845_v0  ;;  %1697 = vmatprep.subr.mxu1 %v406_v30 }
  0x2c   :  { %1698 = vmatpush3.msra.mxu1 %v406_v30 }
  0xcb   :  { %v101_v34 = vpop.f32.mrf.mxu0 }
  0xcc   :  { %1682 = vmatprep.mubr.f32.mxu0 %v101_v34 }
  0xcd   :  { %v1637_v37 = vpop.f32.mrf.mxu0 }
  0xcf   :  { %v104_v39 = vpop.f32.mrf.mxu0 }
  0xd0   :  { %v198_v31 = vpop.f32.mrf.mxu1  ;;  %v2039_v40 = vpack.c.bf16 %v104_v39, %v101_v34  ;;  %1683 = vmatmul.mubr.f32.vlgmr.msra.gmra.mxu0 %v104_v39 }
  0xd1   :  { %v203_v32 = vrot.slane %v198_v31, 1  ;;  %v211_v33 = vrot.slane %v198_v31, 3  ;;  %v207_v36 = vrot.slane %v198_v31, 2  ;;  %v1638_v41 = vpop.f32.mrf.mxu0  ;;  %1723 = vmatprep.mubr.msk.bf16.mxu0 %vm1846_vm0, %v1845_v0 }
  0xd2   :  { %v1649_v35 = vpop.f32.mrf.mxu1 }
  0xd3   :  { %204 = vrot.lane.b32.xlu0 %v203_v32, %s1847_s26  ;;  %212 = vrot.lane.b32.xlu1 %v211_v33, %s1848_s2  ;;  %v363_v32 = vsub.s32 1, %v2057_v47  ;;  %v339_v33 = vld [vmem:[%s2320_s5] sm:$0xf]  ;;  %s1851_s5 = smov 80  }
  0xd4   :  { %v349_v39 = vrot.slane %v339_v33, %v2062_v52 }
  0xd5   :  { %v364_v37 = vrot.slane %v339_v33, %v363_v32  ;;  %v845_v32 = vld [vmem:[%s2321_s10 + $0x60] sm:$0xff] }
  0xd7   :  { %208 = vrot.lane.b32.xlu0 %v207_v36, %s1849_s3  ;;  %224 = vrot.lane.b32.xlu1 %v2037_v38, %s1847_s26  ;;  %v378_v36 = vsub.s32 2, %v2057_v47 }
  0xd9   :  { %v379_v44 = vrot.slane %v339_v33, %v378_v36 }
  0xdb   :  { %226 = vrot.lane.b32.xlu0 %v2045_v42, %s1847_s26  ;;  %230 = vrot.lane.b32.xlu1 %v2037_v38, %s1849_s3 }
  0xdf   :  { %232 = vrot.lane.b32.xlu0 %v2045_v42, %s1849_s3  ;;  %236 = vrot.lane.b32.xlu1 %v2037_v38, %s1848_s2 }
  0xe3   :  { %238 = vrot.lane.b32.xlu0 %v2045_v42, %s1848_s2 }
 0x145   :  { %v205_v43 = vpop.permute.xlu0 %204  ;;  %v213_v46 = vpop.permute.xlu1 %212 }
 0x146   :  { %v216_v48 = vsel %vm215_vm2, %v198_v31, %v205_v43  ;;  %v405_v31 = vld [vmem:[%s2319_s6] sm:$0xff]  ;;  %s1852_s6 = smov 112  }
 0x147   :  { %1699 = vmatprep.subr.mxu1 %v405_v31 }
 0x148   :  { %1700 = vmatpush3.msra.mxu1 %v405_v31 }
 0x149   :  { %v209_v45 = vpop.permute.xlu0 %208  ;;  %v225_v51 = vpop.permute.xlu1 %224  ;;  %1704 = vmatprep.subr.msk.mxu1 %vm504_vm10, %v339_v33 }
 0x14a   :  { %v217_v50 = vsel %vm63_vm1, %v216_v48, %v209_v45  ;;  %v242_v63 = vsel %vm215_vm2, %v2037_v38, %v225_v51  ;;  %v393_v45 = vsub.s32 3, %v2057_v47 }
 0x14b   :  { %v219_v53 = vsel %vm218_vm3, %v217_v50, %v213_v46 }
 0x14c   :  { %v251_v55 = vrot.slane %v219_v53, %v2062_v52 }
 0x14d   :  { %v227_v49 = vpop.permute.xlu0 %226  ;;  %v231_v56 = vpop.permute.xlu1 %230 }
 0x14e   :  { %v243_v59 = vsel %vm215_vm2, %v2045_v42, %v227_v49  ;;  %v244_v7 = vsel %vm63_vm1, %v242_v63, %v231_v56  ;;  %v394_v56 = vrot.slane %v339_v33, %v393_v45 }
 0x151   :  { %v233_v54 = vpop.permute.xlu0 %232  ;;  %v237_v8 = vpop.permute.xlu1 %236 }
 0x152   :  { %v245_v3 = vsel %vm63_vm1, %v243_v59, %v233_v54  ;;  %v246_v13 = vsel %vm218_vm3, %v244_v7, %v237_v8 }
 0x155   :  { %v239_v4 = vpop.permute.xlu0 %238 }
 0x156   :  { %v247_v9 = vsel %vm218_vm3, %v245_v3, %v239_v4 }
 0x190   :  { %v1684_v57 = vpop.f32.mrf.mxu0 }
 0x191   :  { %v324_v60 = vadd.f32 %v1684_v57, %v251_v55 }
 0x192   :  { %v318_v61 = vpop.f32.mrf.mxu0 }
 0x193   :  { %v330_v1 = vadd.f32 %v328_v58, %v324_v60  ;;  %v319_v2 = vadd.f32 %v318_v61, %v251_v55 }
 0x195   :  { %vm332_vm4 = vcmp.gt.f32.partialorder %v330_v1, 0.0  ;;  %v334_v5 = vmul.f32 0.2, %v330_v1  ;;  %v329_v6 = vadd.f32 %v327_v62, %v319_v2 }
 0x197   :  { %v336_v10 = vsel %vm332_vm4, %v330_v1, %v334_v5  ;;  %v333_v11 = vmul.f32 0.2, %v329_v6  ;;  %vm331_vm6 = vcmp.gt.f32.partialorder %v329_v6, 0.0 }
 0x198   :  { %v2079_v12 = vadd.f32 %v336_v10, %v247_v9 }
 0x199   :  { %v335_v14 = vsel %vm331_vm6, %v329_v6, %v333_v11 }
 0x19a   :  { %v2082_v15 = vadd.f32 %v335_v14, %v246_v13  ;;  %v358_v16 = vsel %vm354_vm5, %v2079_v12, -inf  ;;  %v343_v17 = vsel %vm215_vm2, %v2079_v12, -inf  ;;  %v373_v21 = vsel %vm369_vm7, %v2079_v12, -inf }
 0x19b   :  { %359 = vmax.xlane.f32.xlu1 %v358_v16  ;;  %344 = vmax.xlane.f32.xlu0 %v343_v17  ;;  %v388_v23 = vsel %vm384_vm8, %v2079_v12, -inf }
 0x19c   :  { %v355_v18 = vsel %vm354_vm5, %v2082_v15, -inf  ;;  %v340_v19 = vsel %vm215_vm2, %v2082_v15, -inf  ;;  %v370_v20 = vsel %vm369_vm7, %v2082_v15, -inf  ;;  %v385_v22 = vsel %vm384_vm8, %v2082_v15, -inf }
 0x19f   :  { %356 = vmax.xlane.f32.xlu0 %v355_v18  ;;  %341 = vmax.xlane.f32.xlu1 %v340_v19 }
 0x1a3   :  { %371 = vmax.xlane.f32.xlu0 %v370_v20  ;;  %374 = vmax.xlane.f32.xlu1 %v373_v21 }
 0x1a7   :  { %386 = vmax.xlane.f32.xlu0 %v385_v22  ;;  %389 = vmax.xlane.f32.xlu1 %v388_v23 }
 0x1bd   :  { %635 = vrot.lane.b32.xlu0 %v2039_v40, %s1850_s24 }
 0x1c1   :  { %733 = vrot.lane.b32.xlu0 %v2039_v40, %s1849_s3 }
 0x224   :  { %v360_v34 = vpop.xlane.xlu1 %359  ;;  %v345_v35 = vpop.xlane.xlu0 %344 }
 0x225   :  { %v366_v46 = vmul.f32 %v364_v37, %v360_v34  ;;  %v351_v48 = vmul.f32 %v349_v39, %v345_v35 }
 0x227   :  { %v368_v57 = vadd.f32 %v366_v46, %v351_v48  ;;  %v841_v48 = vld [vmem:[%s2321_s10 + $0x40] sm:$0xff] }
 0x228   :  { %v357_v41 = vpop.xlane.xlu0 %356  ;;  %v342_v43 = vpop.xlane.xlu1 %341 }
 0x229   :  { %v365_v49 = vmul.f32 %v364_v37, %v357_v41  ;;  %v350_v50 = vmul.f32 %v349_v39, %v342_v43  ;;  %v843_v37 = vld [vmem:[%s2321_s10 + $0x50] sm:$0xff]  ;;  %v844_v39 = vld [vmem:[%s2321_s10 + $0x58] sm:$0xff] }
 0x22a   :  { %v854_v41 = vpack.c.bf16 %v844_v39, %v843_v37  ;;  %v985_v39 = vld [vmem:[%s2324_s11 + $0x10] sm:$0xff] }
 0x22b   :  { %v367_v58 = vadd.f32 %v365_v49, %v350_v50  ;;  %v842_v49 = vld [vmem:[%s2321_s10 + $0x48] sm:$0xff] }
 0x22c   :  { %v372_v51 = vpop.xlane.xlu0 %371  ;;  %v375_v53 = vpop.xlane.xlu1 %374  ;;  %v853_v50 = vpack.c.bf16 %v842_v49, %v841_v48 }
 0x22d   :  { %v380_v54 = vmul.f32 %v379_v44, %v372_v51  ;;  %v381_v55 = vmul.f32 %v379_v44, %v375_v53 }
 0x22f   :  { %v382_v61 = vadd.f32 %v380_v54, %v367_v58  ;;  %v383_v62 = vadd.f32 %v381_v55, %v368_v57  ;;  %v840_v57 = vld [vmem:[%s2321_s10 + $0x38] sm:$0xff] }
 0x230   :  { %v387_v59 = vpop.xlane.xlu0 %386  ;;  %v390_v60 = vpop.xlane.xlu1 %389 }
 0x231   :  { %v395_v63 = vmul.f32 %v394_v56, %v387_v59  ;;  %v396_v1 = vmul.f32 %v394_v56, %v390_v60  ;;  %v839_v56 = vld [vmem:[%s2321_s10 + $0x30] sm:$0xff]  ;;  %v837_v59 = vld [vmem:[%s2321_s10 + $0x20] sm:$0xff]  ;;  %v838_v60 = vld [vmem:[%s2321_s10 + $0x28] sm:$0xff] }
 0x232   :  { %v852_v58 = vpack.c.bf16 %v840_v57, %v839_v56  ;;  %v1110_v56 = vld [vmem:[%s2325_s14] sm:$0xff]  ;;  %v1111_v57 = vld [vmem:[%s2325_s14 + $0x8] sm:$0xff] }
 0x233   :  { %v397_v2 = vadd.f32 %v395_v63, %v382_v61  ;;  %v398_v3 = vadd.f32 %v396_v1, %v383_v62  ;;  %v851_v61 = vpack.c.bf16 %v838_v60, %v837_v59  ;;  %v835_v62 = vld [vmem:[%s2321_s10 + $0x10] sm:$0xff]  ;;  %v836_v63 = vld [vmem:[%s2321_s10 + $0x18] sm:$0xff] }
 0x234   :  { %v636_v18 = vpop.permute.xlu0 %635  ;;  %v850_v1 = vpack.c.bf16 %v836_v63, %v835_v62 }
 0x235   :  { %v399_v47 = vsub.f32 %v2082_v15, %v397_v2  ;;  %v400_v4 = vsub.f32 %v2079_v12, %v398_v3  ;;  %v833_v2 = vld [vmem:[%s2321_s10] sm:$0xff]  ;;  %v834_v3 = vld [vmem:[%s2321_s10 + $0x8] sm:$0xff] }
 0x237   :  { %v401_v5 = vmul.f32 1.442695, %v399_v47  ;;  %v403_v6 = vmul.f32 1.442695, %v400_v4  ;;  %v849_v47 = vpack.c.bf16 %v834_v3, %v833_v2  ;;  %v901_v4 = vld [vmem:[%s2322_s12 + $0x18] sm:$0xff] }
 0x238   :  { %v734_v20 = vpop.permute.xlu0 %733 }
 0x239   :  { %1821 = vpow2.f32 %v401_v5  ;;  %v900_v5 = vld [vmem:[%s2322_s12 + $0x10] sm:$0xff] }
 0x23a   :  { %1823 = vpow2.f32 %v403_v6 }
 0x246   :  { %v1822_v7 = vpop.eup %1821 }
 0x247   :  { %v1824_v8 = vpop.eup %1823  ;;  %1701 = vmatprep.mubr.msk.f32.mxu1 %vm413_vm9, %v1822_v7 }
 0x248   :  { %1702 = vmatmul.mubr.msk.f32.vlgmr.msra.gmra.mxu1 %vm413_vm9, %v1824_v8 }
 0x249   :  { %1705 = vmatpush3.msk.msra.mxu1 %vm504_vm10, %v339_v33  ;;  %v846_v33 = vld [vmem:[%s2321_s10 + $0x68] sm:$0xff] }
 0x24a   :  { %1709 = vmatprep.subr.bf16.mxu1 %v1845_v0  ;;  %v855_v34 = vpack.c.bf16 %v846_v33, %v845_v32  ;;  %v898_v32 = vld [vmem:[%s2322_s12] sm:$0xff]  ;;  %v986_v33 = vld [vmem:[%s2324_s11 + $0x18] sm:$0xff] }
 0x308   :  { %v1703_v9 = vpop.f32.mrf.mxu1 }
 0x30a   :  { %v486_v10 = vpop.f32.mrf.mxu1 }
 0x30b   :  { %1825 = vrcp.f32 %v486_v10  ;;  %v1534_v10 = vld [vmem:[%s2323_s7] ss:$0 sm:$0xff] }
 0x30c   :  { %1827 = vrcp.f32 %v1703_v9 }
 0x318   :  { %v1826_v11 = vpop.eup %1825 }
 0x319   :  { %v1828_v12 = vpop.eup %1827  ;;  %1706 = vmatprep.mubr.msk.f32.mxu1 %vm497_vm11, %v1826_v11 }
 0x31a   :  { %1707 = vmatmul.mubr.msk.f32.vlgmr.msra.gmra.mxu1 %vm497_vm11, %v1828_v12 }
 0x31b   :  { %1710 = vmatpush3.bf16.msra.mxu1 %v2039_v40  ;;  %1711 = vmatprep.mubr.msk.bf16.mxu1 %vm1846_vm0, %v1845_v0 }
 0x31c   :  { %1715 = vmatprep.subr.bf16.mxu1 %v1845_v0 }
 0x3da   :  { %v1708_v13 = vpop.f32.mrf.mxu1 }
 0x3db   :  { %v584_v15 = vmul.f32 %v1824_v8, %v1708_v13 }
 0x3dc   :  { %v574_v14 = vpop.f32.mrf.mxu1 }
 0x3dd   :  { %v583_v16 = vmul.f32 %v1822_v7, %v574_v14 }
 0x3df   :  { %v585_v17 = vpack.c.bf16 %v584_v15, %v583_v16 }
 0x3e1   :  { %731 = vrot.lane.b32.xlu0 %v585_v17, %s1851_s5  ;;  %632 = vrot.lane.b32.xlu1 %v585_v17, %s1852_s6 }
 0x3e2   :  { %1712 = vmatmul.mubr.msk.bf16.vlgmr.msra.gmra.mxu1 %vm215_vm2, %v585_v17 }
 0x3e3   :  { %1716 = vmatpush3.bf16.msra.mxu1 %v636_v18  ;;  %1717 = vmatprep.mubr.msk.bf16.mxu1 %vm1846_vm0, %v1845_v0 }
 0x3e4   :  { %1727 = vmatprep.subr.bf16.mxu1 %v1845_v0 }
 0x3e5   :  { %684 = vrot.lane.b32.xlu1 %v2039_v40, %s1853_s4 }
 0x3e9   :  { %682 = vrot.lane.b32.xlu1 %v585_v17, %s1850_s24 }
 0x453   :  { %v633_v19 = vpop.permute.xlu1 %632  ;;  %v732_v22 = vpop.permute.xlu0 %731 }
 0x454   :  { %1718 = vmatmul.mubr.msk.bf16.vlgmr.msra.gmra.mxu1 %vm215_vm2, %v633_v19 }
 0x455   :  { %1728 = vmatpush3.bf16.msra.mxu1 %v734_v20  ;;  %1729 = vmatprep.mubr.msk.bf16.mxu1 %vm1846_vm0, %v1845_v0 }
 0x456   :  { %1753 = vmatprep.subr.mxu1 %v901_v4 }
 0x457   :  { %v685_v21 = vpop.permute.xlu1 %684 }
 0x458   :  { %1722 = vmatpush3.bf16.msra.mxu0 %v685_v21 }
 0x459   :  { %1733 = vmatprep.subr.bf16.mxu0 %v1845_v0 }
 0x45b   :  { %v683_v23 = vpop.permute.xlu1 %682 }
 0x45c   :  { %1724 = vmatmul.mubr.msk.bf16.vlgmr.msra.gmra.mxu0 %vm215_vm2, %v683_v23  ;;  %1730 = vmatmul.mubr.msk.bf16.vlgmr.msra.gmra.mxu1 %vm215_vm2, %v732_v22 }
 0x45d   :  { %1749 = vmatprep.mubr.msk.bf16.mxu0 %vm1846_vm0, %v1845_v0  ;;  %1734 = vmatpush3.bf16.msra.mxu0 %v856_v29 }
 0x45e   :  { %1735 = vmatprep.subr.bf16.mxu0 %v1845_v0  ;;  %1754 = vmatpush3.msra.mxu1 %v901_v4 }
 0x45f   :  { %1755 = vmatprep.subr.mxu1 %v900_v5 }
 0x460   :  { %1756 = vmatpush3.msra.mxu1 %v900_v5 }
 0x461   :  { %1736 = vmatpush3.bf16.msra.mxu0 %v855_v34  ;;  %v1854_v34 = vmov 0  }
 0x462   :  { %1737 = vmatprep.subr.bf16.mxu0 %v1845_v0  ;;  %1819 = vset.pattern.permute.xlu0 %v1854_v34 }
 0x463   :  { %1820 = vset.pattern.permute.xlu1 %v1854_v34 }
 0x465   :  { %1738 = vmatpush3.bf16.msra.mxu0 %v854_v41 }
 0x466   :  { %1739 = vmatprep.subr.bf16.mxu0 %v1845_v0 }
 0x469   :  { %1740 = vmatpush3.bf16.msra.mxu0 %v853_v50 }
 0x46a   :  { %1741 = vmatprep.subr.bf16.mxu0 %v1845_v0 }
 0x46d   :  { %1742 = vmatpush3.bf16.msra.mxu0 %v852_v58 }
 0x46e   :  { %1743 = vmatprep.subr.bf16.mxu0 %v1845_v0 }
 0x471   :  { %1744 = vmatpush3.bf16.msra.mxu0 %v851_v61 }
 0x472   :  { %1745 = vmatprep.subr.bf16.mxu0 %v1845_v0 }
 0x475   :  { %1746 = vmatpush3.bf16.msra.mxu0 %v850_v1 }
 0x476   :  { %1747 = vmatprep.subr.bf16.mxu0 %v1845_v0 }
 0x479   :  { %1748 = vmatpush3.bf16.msra.mxu0 %v849_v47 }
 0x47a   :  { %1795 = vmatprep.subr.mxu0 %v1845_v0 }
 0x4a2   :  { %v2153_v40 = vpop.f32.mrf.mxu1 }
 0x4a4   :  { %v1713_v24 = vpop.f32.mrf.mxu1 }
 0x4a6   :  { %v2155_v25 = vpop.f32.mrf.mxu1 }
 0x4a8   :  { %v1714_v26 = vpop.f32.mrf.mxu1 }
 0x514   :  { %v675_v30 = vpop.f32.mrf.mxu1 }
 0x515   :  { %782 = vrot.lane.b32.xlu1 %v675_v30, %s1849_s3 }
 0x516   :  { %v1719_v31 = vpop.f32.mrf.mxu1 }
 0x517   :  { %v899_v31 = vld [vmem:[%s2322_s12 + $0x8] sm:$0xff] }
 0x518   :  { %v678_v35 = vpop.f32.mrf.mxu1  ;;  %1757 = vmatprep.subr.mxu1 %v899_v31 }
 0x519   :  { %784 = vrot.lane.b32.xlu0 %v678_v35, %s1849_s3  ;;  %1758 = vmatpush3.msra.mxu1 %v899_v31 }
 0x51a   :  { %v1720_v36 = vpop.f32.mrf.mxu1  ;;  %1759 = vmatprep.subr.mxu1 %v898_v32 }
 0x51b   :  { %1760 = vmatpush3.msra.mxu1 %v898_v32 }
 0x51c   :  { %v724_v43 = vpop.f32.mrf.mxu0  ;;  %v773_v44 = vpop.f32.mrf.mxu1  ;;  %1764 = vmatprep.subr.mxu1 %v986_v33 }
 0x51d   :  { %790 = vrot.lane.b32.xlu1 %v724_v43, %s1853_s4  ;;  %v984_v43 = vld [vmem:[%s2324_s11 + $0x8] sm:$0xff] }
 0x51e   :  { %v1725_v45 = vpop.f32.mrf.mxu0  ;;  %v1731_v46 = vpop.f32.mrf.mxu1 }
 0x520   :  { %v727_v51 = vpop.f32.mrf.mxu0  ;;  %v776_v53 = vpop.f32.mrf.mxu1 }
 0x521   :  { %792 = vrot.lane.b32.xlu0 %v727_v51, %s1853_s4  ;;  %798 = vrot.lane.b32.xlu1 %v773_v44, %s1850_s24  ;;  %v983_v44 = vld [vmem:[%s2324_s11] sm:$0xff] }
 0x522   :  { %v1726_v54 = vpop.f32.mrf.mxu0  ;;  %v1732_v55 = vpop.f32.mrf.mxu1 }
 0x525   :  { %800 = vrot.lane.b32.xlu0 %v776_v53, %s1850_s24 }
 0x587   :  { %v783_v6 = vpop.permute.xlu1 %782 }
 0x588   :  { %v804_v9 = vsel %vm63_vm1, %v2153_v40, %v783_v6 }
 0x58b   :  { %v785_v7 = vpop.permute.xlu0 %784 }
 0x58c   :  { %v805_v16 = vsel %vm63_vm1, %v2155_v25, %v785_v7 }
 0x58f   :  { %v791_v8 = vpop.permute.xlu1 %790 }
 0x590   :  { %v806_v11 = vsel %vm413_vm9, %v804_v9, %v791_v8 }
 0x593   :  { %v793_v12 = vpop.permute.xlu0 %792  ;;  %v799_v13 = vpop.permute.xlu1 %798 }
 0x594   :  { %v809_v14 = vsel %vm808_vm12, %v806_v11, %v799_v13  ;;  %v807_v17 = vsel %vm413_vm9, %v805_v16, %v793_v12 }
 0x595   :  { %v818_v15 = vadd.f32 %v1534_v10, %v809_v14 }
 0x597   :  { %v822_v18 = vmin.f32 %v818_v15, 0.0  ;;  %v801_v19 = vpop.permute.xlu0 %800  ;;  %vm820_vm13 = vcmp.gt.f32.partialorder %v818_v15, 0.0 }
 0x598   :  { %v810_v20 = vsel %vm808_vm12, %v807_v17, %v801_v19 }
 0x599   :  { %v824_v21 = vmul.f32 1.442695, %v822_v18  ;;  %v819_v22 = vadd.f32 %v1534_v10, %v810_v20  ;;  %v1541_v20 = vld [vmem:[%s2326_s13] ss:$0 sm:$0xff] }
 0x59b   :  { %1829 = vpow2.f32 %v824_v21  ;;  %v823_v23 = vmin.f32 %v819_v22, 0.0  ;;  %vm821_vm14 = vcmp.gt.f32.partialorder %v819_v22, 0.0 }
 0x59d   :  { %v826_v40 = vmul.f32 1.442695, %v823_v23 }
 0x59f   :  { %1831 = vpow2.f32 %v826_v40 }
 0x5a8   :  { %v1830_v24 = vpop.eup %1829 }
 0x5a9   :  { %v1535_v26 = vadd.f32 -1.0, %v1830_v24 }
 0x5ab   :  { %v830_v29 = vsel %vm820_vm13, %v818_v15, %v1535_v26 }
 0x5ac   :  { %v1832_v27 = vpop.eup %1831 }
 0x5ad   :  { %v1536_v28 = vadd.f32 -1.0, %v1832_v27 }
 0x5af   :  { %v831_v25 = vsel %vm821_vm14, %v819_v22, %v1536_v28 }
 0x5b0   :  { %v832_v30 = vpack.c.bf16 %v831_v25, %v830_v29 }
 0x5b2   :  { %1750 = vmatmul.mubr.bf16.vlgmr.msra.gmra.mxu0 %v832_v30 }
 0x5b3   :  { %1799 = vmatprep.mubr.msk.f32.mxu0 %vm1846_vm0, %v1845_v0 }
 0x672   :  { %v891_v35 = vpop.f32.mrf.mxu0 }
 0x673   :  { %1761 = vmatprep.mubr.msk.f32.mxu1 %vm63_vm1, %v891_v35 }
 0x674   :  { %v1751_v36 = vpop.f32.mrf.mxu0 }
 0x676   :  { %v894_v37 = vpop.f32.mrf.mxu0 }
 0x677   :  { %1762 = vmatmul.mubr.msk.f32.vlgmr.msra.gmra.mxu1 %vm63_vm1, %v894_v37  ;;  %v1145_v45 = vpack.c.bf16 %v894_v37, %v891_v35 }
 0x678   :  { %1765 = vmatpush3.msra.mxu1 %v986_v33  ;;  %v1752_v41 = vpop.f32.mrf.mxu0  ;;  %1772 = vmatprep.mubr.msk.f32.mxu1 %vm63_vm1, %v891_v35  ;;  %v1209_v35 = vld [vmem:[%s2327_s15] sm:$0xff] }
 0x679   :  { %1766 = vmatprep.subr.mxu1 %v985_v39 }
 0x67a   :  { %1767 = vmatpush3.msra.mxu1 %v985_v39  ;;  %v1284_v39 = vrot.slane %v1209_v35, 4 }
 0x67b   :  { %1768 = vmatprep.subr.mxu1 %v984_v43 }
 0x67c   :  { %1769 = vmatpush3.msra.mxu1 %v984_v43 }
 0x67d   :  { %1770 = vmatprep.subr.mxu1 %v983_v44 }
 0x67e   :  { %1771 = vmatpush3.msra.mxu1 %v983_v44 }
 0x67f   :  { %1773 = vmatmul.mubr.msk.f32.vlgmr.msra.gmra.mxu1 %vm63_vm1, %v894_v37  ;;  %1775 = vmatprep.subr.bf16.mxu1 %v1845_v0  ;;  %v1210_v37 = vld [vmem:[%s2327_s15 + $0x8] sm:$0xff] }
 0x680   :  { %1776 = vmatpush3.bf16.msra.mxu1 %v1145_v45  ;;  %1777 = vmatprep.mubr.msk.bf16.mxu1 %vm1846_vm0, %v1845_v0  ;;  %v1430_v41 = vrot.slane %v1210_v37, 4 }
 0x681   :  { %1781 = vmatprep.subr.mxu1 %v1845_v0 }
 0x737   :  { %v1763_v46 = vpop.f32.mrf.mxu1 }
 0x738   :  { %1101 = vperm.xlu0 %1819, %v1763_v46  }
 0x739   :  { %v974_v48 = vpop.f32.mrf.mxu1 }
 0x73a   :  { %1096 = vperm.xlu1 %1820, %v974_v48  }
 0x73f   :  { %v1774_v49 = vpop.f32.mrf.mxu1 }
 0x741   :  { %v1053_v50 = vpop.f32.mrf.mxu1 }
 0x763   :  { %1062 = vxpose.xlu1.b32.start [1/2] (short) (narrow) %v1053_v50, 8 }
 0x767   :  { %1063 = vxpose.xlu1.b32.end [2/2] (short) (narrow) %v1774_v49, 8 }
 0x7b3   :  { %v1102_v55 = vpop.permute.xlu0 %1101 }
 0x7b5   :  { %v1097_v51 = vpop.permute.xlu1 %1096 }
 0x7df   :  { %v1078_v53 = vpop.trf.xlu1 }
 0x7e0   :  { %v1107_v54 = vrot.slane %v1078_v53, %v2062_v52 }
 0x7e2   :  { %v1108_v58 = vadd.f32 %v1107_v54, %v1097_v51  ;;  %v1109_v59 = vadd.f32 %v1107_v54, %v1102_v55 }
 0x7e4   :  { %v1112_v60 = vadd.f32 %v1110_v56, %v1108_v58  ;;  %v1113_v61 = vadd.f32 %v1111_v57, %v1109_v59 }
 0x7e6   :  { %vm1114_vm15 = vcmp.gt.f32.partialorder %v1112_v60, 0.0  ;;  %v1116_v62 = vmul.f32 0.2, %v1112_v60  ;;  %vm1115_vm3 = vcmp.gt.f32.partialorder %v1113_v61, 0.0  ;;  %v1117_v63 = vmul.f32 0.2, %v1113_v61 }
 0x7e8   :  { %v1118_v1 = vsel %vm1114_vm15, %v1112_v60, %v1116_v62  ;;  %v1119_v2 = vsel %vm1115_vm3, %v1113_v61, %v1117_v63 }
 0x7e9   :  { %v1120_v52 = vadd.f32 %v1118_v1, %v2037_v38  ;;  %v1121_v47 = vadd.f32 %v1119_v2, %v2045_v42 }
 0x7eb   :  { %v1122_v3 = vsel %vm215_vm2, %v1120_v52, -inf  ;;  %v1125_v4 = vsel %vm215_vm2, %v1121_v47, -inf }
 0x7ec   :  { %1123 = vmax.xlane.f32.xlu0 %v1122_v3 }
 0x7f0   :  { %1126 = vmax.xlane.f32.xlu0 %v1125_v4 }
 0x875   :  { %v1124_v5 = vpop.xlane.xlu0 %1123 }
 0x876   :  { %v1128_v6 = vsub.f32 %v1120_v52, %v1124_v5 }
 0x878   :  { %v1130_v7 = vmul.f32 1.442695, %v1128_v6 }
 0x879   :  { %v1127_v8 = vpop.xlane.xlu0 %1126 }
 0x87a   :  { %1833 = vpow2.f32 %v1130_v7  ;;  %v1129_v9 = vsub.f32 %v1121_v47, %v1127_v8 }
 0x87c   :  { %v1132_v10 = vmul.f32 1.442695, %v1129_v9 }
 0x87e   :  { %1835 = vpow2.f32 %v1132_v10 }
 0x887   :  { %v1834_v11 = vpop.eup %1833 }
 0x888   :  { %v1134_v12 = vsel %vm215_vm2, %v1834_v11, 0.0 }
 0x889   :  { %1135 = vadd.xlane.f32.xlu0 %v1134_v12 }
 0x88b   :  { %v1836_v38 = vpop.eup %1835 }
 0x88c   :  { %v1137_v13 = vsel %vm215_vm2, %v1836_v38, 0.0 }
 0x88d   :  { %1138 = vadd.xlane.f32.xlu1 %v1137_v13 }
 0x912   :  { %v1136_v42 = vpop.xlane.xlu0 %1135 }
 0x913   :  { %1837 = vrcp.f32 %v1136_v42 }
 0x916   :  { %v1139_v14 = vpop.xlane.xlu1 %1138 }
 0x917   :  { %1839 = vrcp.f32 %v1139_v14 }
 0x920   :  { %v1838_v15 = vpop.eup %1837 }
 0x921   :  { %v1142_v18 = vmul.f32 %v1838_v15, %v1834_v11 }
 0x924   :  { %v1840_v16 = vpop.eup %1839 }
 0x925   :  { %v1143_v17 = vmul.f32 %v1840_v16, %v1836_v38 }
 0x927   :  { %v1144_v19 = vpack.c.bf16 %v1143_v17, %v1142_v18 }
 0x929   :  { %1778 = vmatmul.mubr.msk.bf16.vlgmr.msra.gmra.mxu1 %vm215_vm2, %v1144_v19 }
 0x92a   :  { %1785 = vmatprep.mubr.msk.f32.mxu1 %vm1846_vm0, %v1845_v0 }
 0x9e9   :  { %v1190_v21 = vpop.f32.mrf.mxu1 }
 0x9ea   :  { %v1191_v22 = vadd.f32 %v1541_v20, %v1190_v21 }
 0x9eb   :  { %v1779_v23 = vpop.f32.mrf.mxu1 }
 0x9ec   :  { %v1199_v40 = vmin.f32 %v1191_v22, 0.0  ;;  %vm1197_vm5 = vcmp.gt.f32.partialorder %v1191_v22, 0.0 }
 0x9ed   :  { %v1193_v24 = vpop.f32.mrf.mxu1 }
 0x9ee   :  { %v1201_v26 = vmul.f32 1.442695, %v1199_v40  ;;  %v1194_v27 = vadd.f32 %v1541_v20, %v1193_v24 }
 0x9ef   :  { %v1780_v28 = vpop.f32.mrf.mxu1 }
 0x9f0   :  { %v1200_v29 = vmin.f32 %v1194_v27, 0.0  ;;  %1841 = vpow2.f32 %v1201_v26  ;;  %vm1198_vm4 = vcmp.gt.f32.partialorder %v1194_v27, 0.0 }
 0x9f2   :  { %v1203_v25 = vmul.f32 1.442695, %v1200_v29 }
 0x9f4   :  { %1843 = vpow2.f32 %v1203_v25 }
 0x9fd   :  { %v1842_v30 = vpop.eup %1841 }
 0x9fe   :  { %v1543_v33 = vadd.f32 -1.0, %v1842_v30 }
 0xa00   :  { %v1207_v36 = vsel %vm1197_vm5, %v1191_v22, %v1543_v33 }
 0xa01   :  { %v1844_v31 = vpop.eup %1843 }
 0xa02   :  { %v1544_v32 = vadd.f32 -1.0, %v1844_v31 }
 0xa04   :  { %v1208_v34 = vsel %vm1198_vm4, %v1194_v27, %v1544_v32 }
 0xa05   :  { %1782 = vmatpush3.msra.mxu1 %v1208_v34  ;;  %1796 = vmatpush3.msra.mxu0 %v1208_v34 }
 0xa06   :  { %1783 = vmatprep.subr.mxu1 %v1845_v0  ;;  %1797 = vmatprep.subr.mxu0 %v1845_v0 }
 0xa07   :  { %1784 = vmatpush3.msra.mxu1 %v1207_v36  ;;  %1798 = vmatpush3.msra.mxu0 %v1207_v36 }
 0xa08   :  { %1786 = vmatmul.mubr.msk.f32.vlgmr.msra.gmra.mxu1 %vm215_vm2, %v1209_v35  ;;  %1788 = vmatprep.subr.mxu1 %v1845_v0 }
 0xa09   :  { %1800 = vmatmul.mubr.msk.f32.vlgmr.msra.gmra.mxu0 %vm215_vm2, %v1210_v37  ;;  %1789 = vmatpush3.msra.mxu1 %v1208_v34 }
 0xa0a   :  { %1790 = vmatprep.subr.mxu1 %v1845_v0  ;;  %1792 = vmatprep.mubr.msk.f32.mxu1 %vm1846_vm0, %v1845_v0 }
 0xa0b   :  { %1791 = vmatpush3.msra.mxu1 %v1207_v36 }
 0xa0c   :  { %1793 = vmatmul.mubr.msk.f32.vlgmr.msra.gmra.mxu1 %vm215_vm2, %v1284_v39  ;;  %1802 = vmatprep.subr.mxu1 %v1845_v0 }
 0xa0d   :  { %1803 = vmatpush3.msra.mxu1 %v1208_v34  ;;  %1806 = vmatprep.mubr.msk.f32.mxu1 %vm1846_vm0, %v1845_v0 }
 0xa0e   :  { %1804 = vmatprep.subr.mxu1 %v1845_v0 }
 0xa0f   :  { %1805 = vmatpush3.msra.mxu1 %v1207_v36 }
 0xa10   :  { %1807 = vmatmul.mubr.msk.f32.vlgmr.msra.gmra.mxu1 %vm215_vm2, %v1430_v41 }
 0xac8   :  { %v1280_v43 = vpop.f32.mrf.mxu1 }
 0xac9   :  { %v1426_v44 = vpop.f32.mrf.mxu0 }
 0xaca   :  { %1508 = vrot.lane.b32.xlu0 %v1426_v44, %s1853_s4  ;;  %v1787_v45 = vpop.f32.mrf.mxu1 }
 0xacb   :  { %v1801_v46 = vpop.f32.mrf.mxu0 }
 0xacc   :  { %v1353_v48 = vpop.f32.mrf.mxu1 }
 0xace   :  { %1504 = vrot.lane.b32.xlu0 %v1353_v48, %s1849_s3  ;;  %v1794_v49 = vpop.f32.mrf.mxu1 }
 0xad0   :  { %v1499_v50 = vpop.f32.mrf.mxu1 }
 0xad2   :  { %1512 = vrot.lane.b32.xlu0 %v1499_v50, %s1850_s24  ;;  %v1808_v51 = vpop.f32.mrf.mxu1 }
 0xb3c   :  { %v1509_v53 = vpop.permute.xlu0 %1508 }
 0xb40   :  { %v1505_v54 = vpop.permute.xlu0 %1504 }
 0xb41   :  { %v1515_v0 = vsel %vm63_vm1, %v1280_v43, %v1505_v54 }
 0xb42   :  { %v1516_v55 = vsel %vm413_vm9, %v1515_v0, %v1509_v53 }
 0xb44   :  { %v1513_v56 = vpop.permute.xlu0 %1512 }
 0xb45   :  { %v1517_v57 = vsel %vm808_vm12, %v1516_v55, %v1513_v56 }
 0xb46   :  { %1518 = vst [vmem:[%s2328_s16] sm:$0xf] %v1517_v57 }

</bundles_post_ra>
